<compile_context>
chip_gen: v6e
topology: v6e:2x2x1
jax: 0.10.0
libtpu: 0.0.40
codegen_flags: <defaults>
</compile_context>

<pallas_src>
import math
import functools
import jax
import jax.numpy as jnp
from jax.experimental import pallas as pl
from jax.experimental.pallas import tpu as pltpu


def _round_up(x, m):
    return ((x + m - 1) // m) * m


def _maybe_pad2(a, rows, cols):
    pr, pc = rows - a.shape[0], cols - a.shape[1]
    if pr == 0 and pc == 0:
        return a
    return jnp.pad(a, ((0, pr), (0, pc)))


def _default_vmem_limit():
    # Leave headroom for Mosaic internal scratch / intermediates; never claim
    # all of v7x's 64 MiB.
    try:
        cap = pltpu.get_tpu_info().vmem_capacity_bytes
        return int(cap * 13 // 16)          # ~81% of physical VMEM
    except Exception:
        return 48 * 1024 * 1024             # safe on every chip incl. v7x


_GELU_C = 0.7978845608028654  # sqrt(2/pi)


def _gelu_tanh_f32(h):
    # torch.nn.GELU(approximate='tanh'); tanh goes to the EUP slot, f32 math.
    return 0.5 * h * (1.0 + jnp.tanh(_GELU_C * (h + 0.044715 * h * h * h)))


def mlp_kernel_resident(x_ref, wfc_ref, bfc_ref, wproj_ref, bproj_ref, o_ref):
    # Weights fully VMEM-resident (constant index maps); one row tile per step.
    h = jnp.dot(x_ref[...], wfc_ref[...], preferred_element_type=jnp.float32)
    h = h + bfc_ref[...].astype(jnp.float32)
    g = _gelu_tanh_f32(h)
    out = jnp.dot(g.astype(wproj_ref.dtype), wproj_ref[...],
                  preferred_element_type=jnp.float32)
    o_ref[...] = (out + bproj_ref[...].astype(jnp.float32)).astype(o_ref.dtype)


def mlp_kernel_htiled(x_ref, wfc_ref, bfc_ref, wproj_ref, bproj_ref, o_ref,
                      acc_ref):
    # Hidden dim tiled by th; f32 accumulator persists across the H grid axis.
    j = pl.program_id(1)

    @pl.when(j == 0)
    def _():
        acc_ref[...] = jnp.zeros_like(acc_ref)

    h = jnp.dot(x_ref[...], wfc_ref[...], preferred_element_type=jnp.float32)
    h = h + bfc_ref[...].astype(jnp.float32)
    g = _gelu_tanh_f32(h)
    acc_ref[...] += jnp.dot(g.astype(wproj_ref.dtype), wproj_ref[...],
                            preferred_element_type=jnp.float32)

    @pl.when(j == pl.num_programs(1) - 1)
    def _():
        o_ref[...] = (acc_ref[...]
                      + bproj_ref[...].astype(jnp.float32)).astype(o_ref.dtype)


def mlp_pallas(x, w_fc, b_fc, w_proj, b_proj, *,
               tm=512, th=1024, vmem_limit_bytes=None):
    """x: (B, T, C). w_fc: (C, 4C), b_fc: (4C,), w_proj: (4C, C), b_proj: (C,).

    Weights are pre-transposed to (in, out) layout (PyTorch nn.Linear stores
    (out, in)); y = gelu_tanh(x @ w_fc + b_fc) @ w_proj + b_proj.
    """
    B, T, C = x.shape
    H = w_fc.shape[1]
    M = B * T
    itemsize = jnp.dtype(x.dtype).itemsize

    if vmem_limit_bytes is None:
        vmem_limit_bytes = _default_vmem_limit()

    # ---- row tile ------------------------------------------------------
    Mr = _round_up(M, 8)
    tm = min(tm, Mr)
    # v7x megacore: if a large M would otherwise be a single row tile, split it
    # so the "parallel" axis can feed both TensorCores.
    if tm == Mr and Mr >= 512:
        tm = _round_up((Mr + 1) // 2, 8)

    Mp = _round_up(M, tm)
    Cp = _round_up(C, 128)
    Hp128 = _round_up(H, 128)

    # ---- choose residency scheme via a VMEM budget ----------------------
    # Weights counted once (constant index maps -> fetched once), row tiles
    # double-buffered, f32 h/g intermediates counted explicitly.
    resident_need = (2 * Cp * Hp128 * itemsize            # W_fc + W_proj
                     + 2 * (2 * tm * Cp * itemsize)       # x + out, 2 buffers
                     + 2 * tm * Hp128 * 4                 # f32 h, g
                     + 2 * (Hp128 + Cp) * itemsize)       # biases
    weight_resident = resident_need <= int(0.7 * vmem_limit_bytes)

    # ---- pad operands (skip when already aligned; zero padding is exact:
    # padded x cols hit zero W_fc rows, padded hidden cols hit zero W_proj
    # rows, padded out cols/rows sliced off) ------------------------------
    # TODO(synk): in a real model, pre-pad the weights once at parameter setup
    # instead of on every forward call.
    if weight_resident:
        Hp = Hp128
    else:
        th = min(th, Hp128)
        Hp = _round_up(H, th)

    x2 = x.reshape(M, C)
    x2 = _maybe_pad2(x2, Mp, Cp)
    wfc_p = _maybe_pad2(w_fc, Cp, Hp)
    bfc_p = _maybe_pad2(b_fc.reshape(1, H), 1, Hp)
    wproj_p = _maybe_pad2(w_proj, Hp, Cp)
    bproj_p = _maybe_pad2(b_proj.reshape(1, C), 1, Cp)

    n_row = Mp // tm

    if weight_resident:
        grid = (n_row,)
        in_specs = [
            pl.BlockSpec((tm, Cp), lambda i: (i, 0)),      # x rows
            pl.BlockSpec((Cp, Hp), lambda i: (0, 0)),      # W_fc (resident)
            pl.BlockSpec((1, Hp), lambda i: (0, 0)),       # b_fc
            pl.BlockSpec((Hp, Cp), lambda i: (0, 0)),      # W_proj (resident)
            pl.BlockSpec((1, Cp), lambda i: (0, 0)),       # b_proj
        ]
        out_specs = pl.BlockSpec((tm, Cp), lambda i: (i, 0))
        scratch_shapes = []
        kernel = mlp_kernel_resident
        dim_sem = ("parallel",)
        weight_bytes = 2 * Cp * Hp * itemsize              # read once
    else:
        grid = (n_row, Hp // th)
        in_specs = [
            pl.BlockSpec((tm, Cp), lambda i, j: (i, 0)),   # x rows
            pl.BlockSpec((Cp, th), lambda i, j: (0, j)),   # W_fc slice
            pl.BlockSpec((1, th), lambda i, j: (0, j)),    # b_fc slice
            pl.BlockSpec((th, Cp), lambda i, j: (j, 0)),   # W_proj slice
            pl.BlockSpec((1, Cp), lambda i, j: (0, 0)),    # b_proj
        ]
        out_specs = pl.BlockSpec((tm, Cp), lambda i, j: (i, 0))
        scratch_shapes = [pltpu.VMEM((tm, Cp), jnp.float32)]
        kernel = mlp_kernel_htiled
        dim_sem = ("parallel", "arbitrary")
        weight_bytes = n_row * 2 * Cp * Hp * itemsize      # re-streamed per row tile

    cost = pl.CostEstimate(
        flops=4 * Mp * Cp * Hp,                            # two matmuls
        transcendentals=Mp * Hp,                           # tanh in GELU
        bytes_accessed=(weight_bytes
                        + 2 * Mp * Cp * itemsize           # x read + out write
                        + (Hp + Cp) * itemsize),           # biases
    )

    out = pl.pallas_call(
        kernel,
        out_shape=jax.ShapeDtypeStruct((Mp, Cp), x.dtype),
        grid_spec=pltpu.PrefetchScalarGridSpec(
            num_scalar_prefetch=0,
            grid=grid,
            in_specs=in_specs,
            out_specs=out_specs,
            scratch_shapes=scratch_shapes,
        ),
        compiler_params=pltpu.CompilerParams(
            dimension_semantics=dim_sem,
            vmem_limit_bytes=vmem_limit_bytes,
        ),
        cost_estimate=cost,
    )(x2, wfc_p, bfc_p, wproj_p, bproj_p)

    return out[:M, :C].reshape(B, T, C)


def gelu_tanh_ref(x):
    c = math.sqrt(2.0 / math.pi)
    return 0.5 * x * (1.0 + jnp.tanh(c * (x + 0.044715 * x ** 3)))


if __name__ == "__main__":
    # Small config: n_embd=32, batch=2, seq=8
    B, T, C = 2, 8, 32
    H = 4 * C

    key = jax.random.PRNGKey(0)
    kx, k1, k2, k3, k4 = jax.random.split(key, 5)

    x = jax.random.normal(kx, (B, T, C), dtype=jnp.float32)

    # Deterministic param init (PyTorch nn.Linear-like scale), stored
    # pre-transposed as (in, out) for the kernel.
    w_fc = jax.random.normal(k1, (C, H), dtype=jnp.float32) * (1.0 / math.sqrt(C))
    b_fc = jax.random.normal(k2, (H,), dtype=jnp.float32) * 0.01
    w_proj = jax.random.normal(k3, (H, C), dtype=jnp.float32) * (1.0 / math.sqrt(H))
    b_proj = jax.random.normal(k4, (C,), dtype=jnp.float32) * 0.01

    out = mlp_pallas(x, w_fc, b_fc, w_proj, b_proj)
    out = jax.block_until_ready(out)

    # Pure-JAX reference for a sanity check
    ref = gelu_tanh_ref(x @ w_fc + b_fc) @ w_proj + b_proj
    assert out.shape == (B, T, C)
    assert jnp.allclose(out, ref, atol=1e-4, rtol=1e-4), "mismatch vs reference"

    print("KERNEL_OK")
</pallas_src>

<mosaic_0001>
module attributes {stable_mosaic.version = 11 : i64} {
  func.func @mlp_kernel_resident(%arg0: i32, %arg1: memref<16x128xf32, #tpu.memory_space<vmem>>, %arg2: memref<128x128xf32, #tpu.memory_space<vmem>>, %arg3: memref<1x128xf32, #tpu.memory_space<vmem>>, %arg4: memref<128x128xf32, #tpu.memory_space<vmem>>, %arg5: memref<1x128xf32, #tpu.memory_space<vmem>>, %arg6: memref<16x128xf32, #tpu.memory_space<vmem>>) attributes {dimension_semantics = [#tpu.dimension_semantics<parallel>], iteration_bounds = array<i64: 1>, scalar_prefetch = 0 : i64, scratch_operands = 0 : i64, tpu.core_type = #tpu.core_type<tc>, window_params = [{transform_indices = @transform_0, window_bounds = array<i64: 16, 128>}, {pipeline_mode = #tpu.pipeline_mode<synchronous>, transform_indices = @transform_1, window_bounds = array<i64: 128, 128>}, {pipeline_mode = #tpu.pipeline_mode<synchronous>, transform_indices = @transform_2, window_bounds = array<i64: 1, 128>}, {pipeline_mode = #tpu.pipeline_mode<synchronous>, transform_indices = @transform_3, window_bounds = array<i64: 128, 128>}, {pipeline_mode = #tpu.pipeline_mode<synchronous>, transform_indices = @transform_4, window_bounds = array<i64: 1, 128>}, {transform_indices = @transform_5, window_bounds = array<i64: 16, 128>}]} {
    %c0 = arith.constant 0 : index
    %c0_0 = arith.constant 0 : index
    %0 = vector.load %arg1[%c0, %c0_0] : memref<16x128xf32, #tpu.memory_space<vmem>>, vector<16x128xf32>
    %c0_1 = arith.constant 0 : index
    %c0_2 = arith.constant 0 : index
    %1 = vector.load %arg2[%c0_1, %c0_2] : memref<128x128xf32, #tpu.memory_space<vmem>>, vector<128x128xf32>
    %cst = arith.constant dense<0.000000e+00> : vector<16x128xf32>
    %2 = tpu.matmul %0, %1, %cst {dimension_numbers = #tpu.dot_dimension_numbers<[1], [0], [0], [1], [0, 0, 1, 1], [], []>} : vector<16x128xf32>, vector<128x128xf32>, vector<16x128xf32> -> vector<16x128xf32>
    %c0_3 = arith.constant 0 : index
    %c0_4 = arith.constant 0 : index
    %3 = vector.load %arg3[%c0_3, %c0_4] : memref<1x128xf32, #tpu.memory_space<vmem>>, vector<1x128xf32>
    %4 = vector.broadcast %3 : vector<1x128xf32> to vector<16x128xf32>
    %5 = arith.addf %2, %4 : vector<16x128xf32>
    %cst_5 = arith.constant 5.000000e-01 : f32
    %6 = vector.broadcast %cst_5 : f32 to vector<16x128xf32>
    %7 = arith.mulf %6, %5 : vector<16x128xf32>
    %cst_6 = arith.constant 4.471500e-02 : f32
    %8 = vector.broadcast %cst_6 : f32 to vector<16x128xf32>
    %9 = arith.mulf %8, %5 : vector<16x128xf32>
    %10 = arith.mulf %9, %5 : vector<16x128xf32>
    %11 = arith.mulf %10, %5 : vector<16x128xf32>
    %12 = arith.addf %5, %11 : vector<16x128xf32>
    %cst_7 = arith.constant 0.797884583 : f32
    %13 = vector.broadcast %cst_7 : f32 to vector<16x128xf32>
    %14 = arith.mulf %13, %12 : vector<16x128xf32>
    %15 = math.tanh %14 : vector<16x128xf32>
    %cst_8 = arith.constant 1.000000e+00 : f32
    %16 = vector.broadcast %cst_8 : f32 to vector<16x128xf32>
    %17 = arith.addf %16, %15 : vector<16x128xf32>
    %18 = arith.mulf %7, %17 : vector<16x128xf32>
    %c0_9 = arith.constant 0 : index
    %c0_10 = arith.constant 0 : index
    %19 = vector.load %arg4[%c0_9, %c0_10] : memref<128x128xf32, #tpu.memory_space<vmem>>, vector<128x128xf32>
    %cst_11 = arith.constant dense<0.000000e+00> : vector<16x128xf32>
    %20 = tpu.matmul %18, %19, %cst_11 {dimension_numbers = #tpu.dot_dimension_numbers<[1], [0], [0], [1], [0, 0, 1, 1], [], []>} : vector<16x128xf32>, vector<128x128xf32>, vector<16x128xf32> -> vector<16x128xf32>
    %c0_12 = arith.constant 0 : index
    %c0_13 = arith.constant 0 : index
    %21 = vector.load %arg5[%c0_12, %c0_13] : memref<1x128xf32, #tpu.memory_space<vmem>>, vector<1x128xf32>
    %22 = vector.broadcast %21 : vector<1x128xf32> to vector<16x128xf32>
    %23 = arith.addf %20, %22 : vector<16x128xf32>
    %c0_14 = arith.constant 0 : index
    %c0_15 = arith.constant 0 : index
    %24 = vector.load %arg6[%c0_14, %c0_15] : memref<16x128xf32, #tpu.memory_space<vmem>>, vector<16x128xf32>
    tpu.vector_store %arg6[%c0_14, %c0_15], %23 {strides = array<i32>} : memref<16x128xf32, #tpu.memory_space<vmem>>, vector<16x128xf32>,
    return
  }
  func.func @transform_0(%arg0: i32) -> (i32, i32) {
    %c0_i32 = arith.constant 0 : i32
    %c0_i32_0 = arith.constant 0 : i32
    return %arg0, %c0_i32 : i32, i32
  }
  func.func @transform_1(%arg0: i32) -> (i32, i32) {
    %c0_i32 = arith.constant 0 : i32
    %c0_i32_0 = arith.constant 0 : i32
    %c0_i32_1 = arith.constant 0 : i32
    return %c0_i32, %c0_i32_0 : i32, i32
  }
  func.func @transform_2(%arg0: i32) -> (i32, i32) {
    %c0_i32 = arith.constant 0 : i32
    %c0_i32_0 = arith.constant 0 : i32
    %c0_i32_1 = arith.constant 0 : i32
    return %c0_i32, %c0_i32_0 : i32, i32
  }
  func.func @transform_3(%arg0: i32) -> (i32, i32) {
    %c0_i32 = arith.constant 0 : i32
    %c0_i32_0 = arith.constant 0 : i32
    %c0_i32_1 = arith.constant 0 : i32
    return %c0_i32, %c0_i32_0 : i32, i32
  }
  func.func @transform_4(%arg0: i32) -> (i32, i32) {
    %c0_i32 = arith.constant 0 : i32
    %c0_i32_0 = arith.constant 0 : i32
    %c0_i32_1 = arith.constant 0 : i32
    return %c0_i32, %c0_i32_0 : i32, i32
  }
  func.func @transform_5(%arg0: i32) -> (i32, i32) {
    %c0_i32 = arith.constant 0 : i32
    %c0_i32_0 = arith.constant 0 : i32
    return %arg0, %c0_i32 : i32, i32
  }
}

</mosaic_0001>

<bundles_post_ra>
// kernel: tpu_custom_call.1
= control target key start
LH: loop header
LB: loop body
LE: loop exit
PB: predicated region body
PF: predicated region fallthrough
CT: control target
= control target key end

     0   :  { %10 = vsyncpa [#allocation3], 0  ;;  %s568_s0 = inlined_call_operand.hbm [shape: f32[16,128], index: 0, kind: input, shape index: {}]   ;;  %s569_s1 = inlined_call_operand.hbm [shape: f32[128,128], index: 1, kind: input, shape index: {}]   ;;  %s570_s2 = inlined_call_operand.vmem [shape: f32[1,128], index: 2, kind: input, shape index: {}]   ;;  %s571_s3 = inlined_call_operand.hbm [shape: f32[128,128], index: 3, kind: input, shape index: {}]   ;;  %s572_s4 = inlined_call_operand.vmem [shape: f32[1,128], index: 4, kind: input, shape index: {}]   ;;  %s573_s5 = inlined_call_operand.hbm [shape: f32[16,128], index: 5, kind: output, shape index: {}]  }
   0x1   :  { %11 = vsyncpa [#allocation6], 0 }
   0x2   :  { %12 = vsyncpa [#allocation4], 0  ;;  %s502_s18 = smov [#allocation5]   ;;  %s503_s20 = smov [#allocation2]  }
   0x3   :  { %s30_s19 = sshll.u32 %s502_s18, 4  ;;  %s18_s21 = sshll.u32 %s503_s20, 4  ;;  %s31_s19 = int_to_ptr.vmem [resolvable:$true] %s30_s19  ;;  %s19_s21 = int_to_ptr.vmem [resolvable:$true] %s18_s21 }
   0x4   :  { %s424_s22 = scalar_lea.vmem %s31_s19, 2048  ;;  %p429_p1 = scmp.lt.s32.totalorder %s31_s19, %s31_s19 }
   0x5   :  { %p425_p0 = scmp.ne.s32.totalorder %s31_s19, %s424_s22  ;;  %p430_p2 = scmp.lt.s32.totalorder %s424_s22, %s424_s22 }
   0x7   :  { %p431_p3 = por %p430_p2, %p429_p1 }
   0x9   :  { %p432_p4 = pnand %p431_p3, %p425_p0 }
   0xb   :  { %435 = shalt.err (!%p432_p4)
}
   0xc   :  { %s504_s23 = smov 128   ;;  %s505_s24 = smov 8  }
   0xd   :  { %36 = dma.hbm_to_vmem [thread:$0]  %s569_s1, 2048, %s31_s19, [#allocation6], %s504_s23, %s504_s23, %s505_s24  }
   0xe   :  { %s444_s27 = scalar_lea.vmem %s19_s21, 256  ;;  %p449_p6 = scmp.lt.s32.totalorder %s19_s21, %s19_s21 }
   0xf   :  { %p445_p5 = scmp.ne.s32.totalorder %s19_s21, %s444_s27  ;;  %p450_p7 = scmp.lt.s32.totalorder %s444_s27, %s444_s27 }
  0x11   :  { %p451_p8 = por %p450_p7, %p449_p6 }
  0x13   :  { %p452_p9 = pnand %p451_p8, %p445_p5 }
  0x15   :  { %455 = shalt.err (!%p452_p9)
}
  0x16   :  { %24 = dma.hbm_to_vmem [thread:$0]  %s568_s0, 256, %s19_s21, [#allocation3], %s504_s23, %s504_s23, %s505_s24  }
  0x17   :  { %s506_s30 = smov [#allocation7]  }
  0x18   :  { %s44_s6 = sshll.u32 %s506_s30, 4  ;;  %s45_s6 = int_to_ptr.vmem [resolvable:$true] %s44_s6 }
  0x19   :  { %s464_s7 = scalar_lea.vmem %s45_s6, 2048  ;;  %p469_p11 = scmp.lt.s32.totalorder %s45_s6, %s45_s6 }
  0x1a   :  { %p465_p10 = scmp.ne.s32.totalorder %s45_s6, %s464_s7  ;;  %p470_p12 = scmp.lt.s32.totalorder %s464_s7, %s464_s7 }
  0x1c   :  { %p471_p13 = por %p470_p12, %p469_p11 }
  0x1e   :  { %p472_p0 = pnand %p471_p13, %p465_p10 }
  0x20   :  { %475 = shalt.err (!%p472_p0)
}
  0x21   :  { %50 = dma.hbm_to_vmem [thread:$0]  %s571_s3, 2048, %s45_s6, [#allocation6], %s504_s23, %s504_s23, %s505_s24  }
  0x22   :  { %496 = dma.done.wait [#allocation3], 256  }
  0x23   :  { %497 = vsyncadd [#allocation3], 4294967040 }
  0x24   :  { %498 = dma.done.wait [#allocation6], 4096  }
  0x25   :  { %499 = vsyncadd [#allocation6], 4294963200  ;;  %v79_v0 = vld [vmem:[#allocation5 + $0x78] sm:$0xff]  ;;  %v78_v1 = vld [vmem:[#allocation5 + $0x70] sm:$0xff]  ;;  %s507_s10 = smov [#allocation8]  }
  0x26   :  { %336 = vmatprep.subr.mxu0 %v79_v0  ;;  %v77_v2 = vld [vmem:[#allocation5 + $0x68] sm:$0xff]  ;;  %v76_v3 = vld [vmem:[#allocation5 + $0x60] sm:$0xff]  ;;  %v62_v4 = vld [vmem:[#allocation2] sm:$0xff]  ;;  %s285_s11 = sshll.u32 %s507_s10, 4  ;;  %s286_s11 = int_to_ptr.vmem [resolvable:$true] %s285_s11 }
  0x27   :  { %337 = vmatpush3.msra.mxu0 %v79_v0  ;;  %v75_v5 = vld [vmem:[#allocation5 + $0x58] sm:$0xff]  ;;  %368 = vmatprep.mubr.f32.mxu0 %v62_v4  ;;  %v74_v6 = vld [vmem:[#allocation5 + $0x50] sm:$0xff]  ;;  %v73_v7 = vld [vmem:[#allocation5 + $0x48] sm:$0xff]  ;;  %s476_s12 = scalar_lea.vmem %s286_s11, 256  ;;  %p481_p2 = scmp.lt.s32.totalorder %s286_s11, %s286_s11 }
  0x28   :  { %338 = vmatprep.subr.mxu0 %v78_v1  ;;  %v72_v8 = vld [vmem:[#allocation5 + $0x40] sm:$0xff]  ;;  %v71_v9 = vld [vmem:[#allocation5 + $0x38] sm:$0xff]  ;;  %v70_v10 = vld [vmem:[#allocation5 + $0x30] sm:$0xff]  ;;  %p477_p1 = scmp.ne.s32.totalorder %s286_s11, %s476_s12  ;;  %p482_p3 = scmp.lt.s32.totalorder %s476_s12, %s476_s12 }
  0x29   :  { %339 = vmatpush3.msra.mxu0 %v78_v1  ;;  %v69_v11 = vld [vmem:[#allocation5 + $0x28] sm:$0xff]  ;;  %v68_v12 = vld [vmem:[#allocation5 + $0x20] sm:$0xff]  ;;  %v67_v13 = vld [vmem:[#allocation5 + $0x18] sm:$0xff] }
  0x2a   :  { %340 = vmatprep.subr.mxu0 %v77_v2  ;;  %v66_v14 = vld [vmem:[#allocation5 + $0x10] sm:$0xff]  ;;  %v65_v15 = vld [vmem:[#allocation5 + $0x8] sm:$0xff]  ;;  %v64_v16 = vld [vmem:[#allocation5] sm:$0xff]  ;;  %p483_p4 = por %p482_p3, %p481_p2 }
  0x2b   :  { %341 = vmatpush3.msra.mxu0 %v77_v2  ;;  %v63_v17 = vld [vmem:[#allocation2 + $0x8] sm:$0xff]  ;;  %v194_v19 = vld [vmem:[#allocation7 + $0x70] sm:$0xff]  ;;  %v193_v20 = vld [vmem:[#allocation7 + $0x68] sm:$0xff] }
  0x2c   :  { %342 = vmatprep.subr.mxu0 %v76_v3  ;;  %v195_v18 = vld [vmem:[#allocation7 + $0x78] sm:$0xff]  ;;  %v192_v21 = vld [vmem:[#allocation7 + $0x60] sm:$0xff]  ;;  %v190_v23 = vld [vmem:[#allocation7 + $0x50] sm:$0xff]  ;;  %p484_p5 = pnand %p483_p4, %p477_p1 }
  0x2d   :  { %343 = vmatpush3.msra.mxu0 %v76_v3  ;;  %371 = vmatprep.subr.mxu1 %v195_v18  ;;  %v191_v22 = vld [vmem:[#allocation7 + $0x58] sm:$0xff]  ;;  %v189_v24 = vld [vmem:[#allocation7 + $0x48] sm:$0xff]  ;;  %v188_v25 = vld [vmem:[#allocation7 + $0x40] sm:$0xff] }
  0x2e   :  { %344 = vmatprep.subr.mxu0 %v75_v5  ;;  %372 = vmatpush3.msra.mxu1 %v195_v18  ;;  %v187_v26 = vld [vmem:[#allocation7 + $0x38] sm:$0xff]  ;;  %v186_v27 = vld [vmem:[#allocation7 + $0x30] sm:$0xff]  ;;  %v185_v28 = vld [vmem:[#allocation7 + $0x28] sm:$0xff] }
  0x2f   :  { %345 = vmatpush3.msra.mxu0 %v75_v5  ;;  %373 = vmatprep.subr.mxu1 %v194_v19  ;;  %v184_v29 = vld [vmem:[#allocation7 + $0x20] sm:$0xff]  ;;  %v183_v30 = vld [vmem:[#allocation7 + $0x18] sm:$0xff]  ;;  %v182_v31 = vld [vmem:[#allocation7 + $0x10] sm:$0xff] }
  0x30   :  { %346 = vmatprep.subr.mxu0 %v74_v6  ;;  %374 = vmatpush3.msra.mxu1 %v194_v19  ;;  %v181_v32 = vld [vmem:[#allocation7 + $0x8] sm:$0xff]  ;;  %v180_v33 = vld [vmem:[#allocation7] sm:$0xff]  ;;  %v298_v34 = vld [vmem:[%s570_s2] ss:$0 sm:$0xff] }
  0x31   :  { %347 = vmatpush3.msra.mxu0 %v74_v6  ;;  %375 = vmatprep.subr.mxu1 %v193_v20  ;;  %v299_v57 = vld [vmem:[%s572_s4] ss:$0 sm:$0xff] }
  0x32   :  { %348 = vmatprep.subr.mxu0 %v73_v7  ;;  %376 = vmatpush3.msra.mxu1 %v193_v20 }
  0x33   :  { %349 = vmatpush3.msra.mxu0 %v73_v7  ;;  %377 = vmatprep.subr.mxu1 %v192_v21 }
  0x34   :  { %350 = vmatprep.subr.mxu0 %v72_v8  ;;  %378 = vmatpush3.msra.mxu1 %v192_v21 }
  0x35   :  { %351 = vmatpush3.msra.mxu0 %v72_v8  ;;  %379 = vmatprep.subr.mxu1 %v191_v22 }
  0x36   :  { %352 = vmatprep.subr.mxu0 %v71_v9  ;;  %380 = vmatpush3.msra.mxu1 %v191_v22 }
  0x37   :  { %353 = vmatpush3.msra.mxu0 %v71_v9  ;;  %381 = vmatprep.subr.mxu1 %v190_v23 }
  0x38   :  { %354 = vmatprep.subr.mxu0 %v70_v10  ;;  %382 = vmatpush3.msra.mxu1 %v190_v23 }
  0x39   :  { %355 = vmatpush3.msra.mxu0 %v70_v10  ;;  %383 = vmatprep.subr.mxu1 %v189_v24 }
  0x3a   :  { %356 = vmatprep.subr.mxu0 %v69_v11  ;;  %384 = vmatpush3.msra.mxu1 %v189_v24 }
  0x3b   :  { %357 = vmatpush3.msra.mxu0 %v69_v11  ;;  %385 = vmatprep.subr.mxu1 %v188_v25 }
  0x3c   :  { %358 = vmatprep.subr.mxu0 %v68_v12  ;;  %386 = vmatpush3.msra.mxu1 %v188_v25 }
  0x3d   :  { %359 = vmatpush3.msra.mxu0 %v68_v12  ;;  %387 = vmatprep.subr.mxu1 %v187_v26 }
  0x3e   :  { %360 = vmatprep.subr.mxu0 %v67_v13  ;;  %388 = vmatpush3.msra.mxu1 %v187_v26 }
  0x3f   :  { %361 = vmatpush3.msra.mxu0 %v67_v13  ;;  %389 = vmatprep.subr.mxu1 %v186_v27 }
  0x40   :  { %362 = vmatprep.subr.mxu0 %v66_v14  ;;  %390 = vmatpush3.msra.mxu1 %v186_v27 }
  0x41   :  { %363 = vmatpush3.msra.mxu0 %v66_v14  ;;  %391 = vmatprep.subr.mxu1 %v185_v28 }
  0x42   :  { %364 = vmatprep.subr.mxu0 %v65_v15  ;;  %392 = vmatpush3.msra.mxu1 %v185_v28 }
  0x43   :  { %365 = vmatpush3.msra.mxu0 %v65_v15  ;;  %393 = vmatprep.subr.mxu1 %v184_v29 }
  0x44   :  { %366 = vmatprep.subr.mxu0 %v64_v16  ;;  %394 = vmatpush3.msra.mxu1 %v184_v29 }
  0x45   :  { %367 = vmatpush3.msra.mxu0 %v64_v16  ;;  %395 = vmatprep.subr.mxu1 %v183_v30 }
  0x46   :  { %369 = vmatmul.mubr.f32.vlgmr.msra.gmra.mxu0 %v63_v17  ;;  %396 = vmatpush3.msra.mxu1 %v183_v30 }
  0x47   :  { %397 = vmatprep.subr.mxu1 %v182_v31 }
  0x48   :  { %398 = vmatpush3.msra.mxu1 %v182_v31 }
  0x49   :  { %399 = vmatprep.subr.mxu1 %v181_v32 }
  0x4a   :  { %400 = vmatpush3.msra.mxu1 %v181_v32 }
  0x4b   :  { %401 = vmatprep.subr.mxu1 %v180_v33 }
  0x4c   :  { %402 = vmatpush3.msra.mxu1 %v180_v33 }
 0x106   :  { %v370_v35 = vpop.f32.mrf.mxu0 }
 0x107   :  { %v159_v36 = vadd.f32 %v370_v35, %v298_v34 }
 0x108   :  { %v153_v37 = vpop.f32.mrf.mxu0 }
 0x109   :  { %v165_v38 = vmul.f32 0.044715, %v159_v36  ;;  %v154_v39 = vadd.f32 %v298_v34, %v153_v37  ;;  %v163_v54 = vmul.f32 0.5, %v159_v36 }
 0x10b   :  { %v167_v40 = vmul.f32 %v165_v38, %v159_v36  ;;  %v164_v41 = vmul.f32 0.044715, %v154_v39  ;;  %v162_v52 = vmul.f32 0.5, %v154_v39 }
 0x10d   :  { %v166_v42 = vmul.f32 %v164_v41, %v154_v39  ;;  %v169_v43 = vmul.f32 %v167_v40, %v159_v36 }
 0x10f   :  { %v168_v44 = vmul.f32 %v166_v42, %v154_v39  ;;  %v171_v45 = vadd.f32 %v169_v43, %v159_v36 }
 0x111   :  { %v170_v46 = vadd.f32 %v168_v44, %v154_v39  ;;  %v173_v47 = vmul.f32 0.7978846, %v171_v45 }
 0x113   :  { %v172_v48 = vmul.f32 0.7978846, %v170_v46  ;;  %412 = vtanh.f32 %v173_v47 }
 0x115   :  { %414 = vtanh.f32 %v172_v48 }
 0x120   :  { %v413_v49 = vpop.eup %412 }
 0x121   :  { %v177_v51 = vadd.f32 1.0, %v413_v49 }
 0x122   :  { %v415_v50 = vpop.eup %414 }
 0x123   :  { %v176_v53 = vadd.f32 1.0, %v415_v50  ;;  %v179_v56 = vmul.f32 %v177_v51, %v163_v54 }
 0x125   :  { %v178_v55 = vmul.f32 %v176_v53, %v162_v52 }
 0x127   :  { %403 = vmatprep.mubr.f32.mxu1 %v178_v55 }
 0x128   :  { %404 = vmatmul.mubr.f32.vlgmr.msra.gmra.mxu1 %v179_v56 }
 0x1e8   :  { %v405_v58 = vpop.f32.mrf.mxu1 }
 0x1e9   :  { %v275_v59 = vadd.f32 %v405_v58, %v299_v57 }
 0x1ea   :  { %v269_v60 = vpop.f32.mrf.mxu1 }
 0x1eb   :  { %279 = vst [vmem:[#allocation8 + $0x8] sm:$0xff] %v275_v59  ;;  %v270_v61 = vadd.f32 %v299_v57, %v269_v60 }
 0x1ed   :  { %278 = vst [vmem:[#allocation8] sm:$0xff] %v270_v61 }
 0x1ee   :  { %487 = shalt.err (!%p484_p5)
}
 0x1ef   :  { %291 = dma.vmem_to_hbm [thread:$0]  %s286_s11, 256, %s573_s5, [#allocation4], %s504_s23, %s504_s23, %s505_s24  }
 0x1f0   :  { %500 = dma.done.wait [#allocation4], 256  }
 0x1f1   :  { %501 = vsyncadd [#allocation4], 4294967040 }
 0x1f2   :  { %295 = vsyncpa [#allocation3], 1 }
 0x1f3   :  { %296 = vsyncpa [#allocation6], 1 }
 0x1f4   :  { %297 = vsyncpa [#allocation4], 1 }

</bundles_post_ra>
